<compile_context>
chip_gen: v6e
topology: v6e:2x2x1
jax: 0.10.0
libtpu: 0.0.40
codegen_flags: <defaults>
</compile_context>

<pallas_src>
import math

import jax
import jax.numpy as jnp
from jax.experimental import pallas as pl
from jax.experimental.pallas import tpu as pltpu


def _round_up(x: int, m: int) -> int:
    return (x + m - 1) // m * m


# --------------------------------------------------------------------------- #
# Wide path: dim = 2*half with half % 128 == 0.
# --------------------------------------------------------------------------- #
def _wide_kernel(t_ref, f_ref, o_ref):
    """t_ref: (TB, 1); f_ref: (1, half); o_ref: (TB, 2*half).

    emb is computed once over the half width (sin and cos halves share the same
    phases), then written with two lane-dense stores (offset 0 and `half` are
    both multiples of 128, so both stores are unmasked).
    """
    half = f_ref.shape[-1]
    emb = t_ref[...] * f_ref[...]                       # (TB,1)*(1,half) on VPU
    o_ref[:, :half] = jnp.sin(emb).astype(o_ref.dtype)
    o_ref[:, half:] = jnp.cos(emb).astype(o_ref.dtype)


# --------------------------------------------------------------------------- #
# Packed / lane-padded path: dim < 128 dividing 128 (k rows packed per kernel
# row), or awkward dims padded up to the next multiple of 128 (k == 1).
# --------------------------------------------------------------------------- #
def _packed_kernel(t_ref, fm_ref, sel_ref, o_ref):
    """t_ref: (TB, k); fm_ref: (k, W); sel_ref: (1, W); o_ref: (TB, W).

    Column c of an output row belongs to packed batch element j = c // dim;
    fm[j, c] = freq(c) iff c // dim == j else 0, so the full-width phase row is
    built with k exact broadcast FMAs (no gather, no lane concatenate).  sel
    marks the cos half of every dim-wide segment.
    """
    k = t_ref.shape[-1]
    t = t_ref[...]                                      # (TB, k)
    emb = t[:, 0:1] * fm_ref[0:1, :]                    # (TB,1)*(1,W) -> (TB,W)
    for j in range(1, k):                               # small static unroll
        emb = emb + t[:, j:j + 1] * fm_ref[j:j + 1, :]
    out = jnp.where(sel_ref[...] > 0.0, jnp.cos(emb), jnp.sin(emb))
    o_ref[...] = out.astype(o_ref.dtype)                # single lane-dense store


def sinusoidal_pos_emb(t: jax.Array, dim: int, *, out_dtype=jnp.float32) -> jax.Array:
    """t: (B,) -> (B, dim), matching the PyTorch SinusoidalPosEmb forward."""
    assert dim % 2 == 0 and dim >= 4, "dim must be even and >= 4"
    assert t.ndim == 1, "t must be 1-D (one timestep per batch element)"
    B = t.shape[0]
    half = dim // 2

    scale = -math.log(10000.0) / (half - 1)
    f = jnp.exp(jnp.arange(half, dtype=jnp.float32) * scale)     # (half,)

    wide = (half % 128 == 0)
    if wide:                                   # half-width compute, split stores
        k, W = 1, dim
    elif dim < 128 and 128 % dim == 0:         # pack k batch rows per kernel row
        k, W = 128 // dim, 128
    else:                                      # pad lane width up to 128-multiple
        k, W = 1, _round_up(dim, 128)

    rows = pl.cdiv(B, k)
    rows_pad = _round_up(rows, 16)             # sublane-legal for f32 and bf16
    B_pad = rows_pad * k
    t_pad = jnp.pad(t.astype(jnp.float32), (0, B_pad - B)).reshape(rows_pad, k)

    # Row tile: ~2 MiB output tile per buffer (double-buffered -> ~4 MiB, safe
    # for v5e's 16 MiB scoped VMEM), and at least 2 grid steps when the batch
    # allows it so both v7x TensorCores get work.
    tb_target = max(16, ((2 << 20) // (W * 4)) // 16 * 16)
    tb_split = max(16, _round_up(pl.cdiv(rows_pad, 2), 16))
    TB = max(16, min(tb_target, tb_split, rows_pad))
    grid = (pl.cdiv(rows_pad, TB),)            # partial final block is allowed

    cparams = pltpu.CompilerParams(dimension_semantics=("parallel",))

    if wide:
        out = pl.pallas_call(
            _wide_kernel,
            out_shape=jax.ShapeDtypeStruct((rows_pad, W), out_dtype),
            grid=grid,
            in_specs=[
                pl.BlockSpec((TB, 1), lambda i: (i, 0)),      # timesteps
                pl.BlockSpec((1, half), lambda i: (0, 0)),    # frequency table
            ],
            out_specs=pl.BlockSpec((TB, W), lambda i: (i, 0)),
            compiler_params=cparams,
        )(t_pad, f.reshape(1, half))
        return out[:B]

    # ---- constant tables for the packed / lane-padded path -------------------
    base = jnp.concatenate([f, f])                             # (dim,) phases
    sel_seg = jnp.concatenate([jnp.zeros((half,), jnp.float32),
                               jnp.ones((half,), jnp.float32)])
    fm = jnp.zeros((k, W), jnp.float32)
    sel = jnp.zeros((1, W), jnp.float32)
    for j in range(k):
        fm = fm.at[j, j * dim:(j + 1) * dim].set(base)
        sel = sel.at[0, j * dim:(j + 1) * dim].set(sel_seg)

    out = pl.pallas_call(
        _packed_kernel,
        out_shape=jax.ShapeDtypeStruct((rows_pad, W), out_dtype),
        grid=grid,
        in_specs=[
            pl.BlockSpec((TB, k), lambda i: (i, 0)),   # packed timesteps
            pl.BlockSpec((k, W), lambda i: (0, 0)),    # masked frequency table
            pl.BlockSpec((1, W), lambda i: (0, 0)),    # sin/cos column selector
        ],
        out_specs=pl.BlockSpec((TB, W), lambda i: (i, 0)),
        compiler_params=cparams,
    )(t_pad, fm, sel)

    if W == k * dim:                   # packed: unpack k batch rows per kernel row
        return out.reshape(B_pad, dim)[:B]
    return out[:B, :dim]               # lane-padded: drop the pad lanes


def _reference(t: jax.Array, dim: int) -> jax.Array:
    half = dim // 2
    emb = math.log(10000.0) / (half - 1)
    emb = jnp.exp(jnp.arange(half, dtype=jnp.float32) * -emb)
    emb = t[:, None] * emb[None, :]
    return jnp.concatenate([jnp.sin(emb), jnp.cos(emb)], axis=-1)


def _check(t, dim, atol=2e-5, rtol=2e-5):
    out = jax.block_until_ready(sinusoidal_pos_emb(t, dim))
    ref = _reference(t, dim)
    assert out.shape == (t.shape[0], dim) and out.dtype == jnp.float32
    assert jnp.allclose(out, ref, atol=atol, rtol=rtol), f"mismatch vs reference (dim={dim})"


if __name__ == "__main__":
    key = jax.random.PRNGKey(0)
    k1, k2, k3, k4 = jax.random.split(key, 4)

    # Packed small-dim path (k = 4 batch rows per kernel row).
    _check(jax.random.uniform(k1, (8,), dtype=jnp.float32) * 1000.0, 32)

    # Wide path (half = 128): half-width phases + two lane-dense stores.
    _check(jax.random.uniform(k2, (10,), dtype=jnp.float32) * 1000.0, 256)

    # Awkward dim (96): lane width padded up to 128, pad lanes sliced off.
    _check(jax.random.uniform(k3, (6,), dtype=jnp.float32) * 1000.0, 96)

    # Larger batch: exercises a multi-step grid with a partial final row block.
    _check(jax.random.uniform(k4, (150,), dtype=jnp.float32) * 1000.0, 32)

    print("KERNEL_OK")
</pallas_src>

<mosaic_0001>
module attributes {stable_mosaic.version = 11 : i64} {
  func.func @_packed_kernel(%arg0: i32, %arg1: memref<16x4xf32, #tpu.memory_space<vmem>>, %arg2: memref<4x128xf32, #tpu.memory_space<vmem>>, %arg3: memref<1x128xf32, #tpu.memory_space<vmem>>, %arg4: memref<16x128xf32, #tpu.memory_space<vmem>>) attributes {dimension_semantics = [#tpu.dimension_semantics<parallel>], iteration_bounds = array<i64: 1>, scalar_prefetch = 0 : i64, scratch_operands = 0 : i64, tpu.core_type = #tpu.core_type<tc>, window_params = [{transform_indices = @transform_0, window_bounds = array<i64: 16, 4>}, {pipeline_mode = #tpu.pipeline_mode<synchronous>, transform_indices = @transform_1, window_bounds = array<i64: 4, 128>}, {pipeline_mode = #tpu.pipeline_mode<synchronous>, transform_indices = @transform_2, window_bounds = array<i64: 1, 128>}, {transform_indices = @transform_3, window_bounds = array<i64: 16, 128>}]} {
    %c0 = arith.constant 0 : index
    %c0_0 = arith.constant 0 : index
    %0 = vector.load %arg1[%c0, %c0_0] : memref<16x4xf32, #tpu.memory_space<vmem>>, vector<16x4xf32>
    %1 = vector.extract_strided_slice %0 {offsets = [0, 0], sizes = [16, 1], strides = [1, 1]} : vector<16x4xf32> to vector<16x1xf32>
    %c0_1 = arith.constant 0 : index
    %c0_2 = arith.constant 0 : index
    %2 = vector.load %arg2[%c0_1, %c0_2] : memref<4x128xf32, #tpu.memory_space<vmem>>, vector<1x128xf32>
    %3 = vector.broadcast %1 : vector<16x1xf32> to vector<16x128xf32>
    %4 = vector.broadcast %2 : vector<1x128xf32> to vector<16x128xf32>
    %5 = arith.mulf %3, %4 : vector<16x128xf32>
    %6 = vector.extract_strided_slice %0 {offsets = [0, 1], sizes = [16, 1], strides = [1, 1]} : vector<16x4xf32> to vector<16x1xf32>
    %c1 = arith.constant 1 : index
    %c0_3 = arith.constant 0 : index
    %7 = vector.load %arg2[%c1, %c0_3] : memref<4x128xf32, #tpu.memory_space<vmem>>, vector<1x128xf32>
    %8 = vector.broadcast %6 : vector<16x1xf32> to vector<16x128xf32>
    %9 = vector.broadcast %7 : vector<1x128xf32> to vector<16x128xf32>
    %10 = arith.mulf %8, %9 : vector<16x128xf32>
    %11 = arith.addf %5, %10 : vector<16x128xf32>
    %12 = vector.extract_strided_slice %0 {offsets = [0, 2], sizes = [16, 1], strides = [1, 1]} : vector<16x4xf32> to vector<16x1xf32>
    %c2 = arith.constant 2 : index
    %c0_4 = arith.constant 0 : index
    %13 = vector.load %arg2[%c2, %c0_4] : memref<4x128xf32, #tpu.memory_space<vmem>>, vector<1x128xf32>
    %14 = vector.broadcast %12 : vector<16x1xf32> to vector<16x128xf32>
    %15 = vector.broadcast %13 : vector<1x128xf32> to vector<16x128xf32>
    %16 = arith.mulf %14, %15 : vector<16x128xf32>
    %17 = arith.addf %11, %16 : vector<16x128xf32>
    %18 = vector.extract_strided_slice %0 {offsets = [0, 3], sizes = [16, 1], strides = [1, 1]} : vector<16x4xf32> to vector<16x1xf32>
    %c3 = arith.constant 3 : index
    %c0_5 = arith.constant 0 : index
    %19 = vector.load %arg2[%c3, %c0_5] : memref<4x128xf32, #tpu.memory_space<vmem>>, vector<1x128xf32>
    %20 = vector.broadcast %18 : vector<16x1xf32> to vector<16x128xf32>
    %21 = vector.broadcast %19 : vector<1x128xf32> to vector<16x128xf32>
    %22 = arith.mulf %20, %21 : vector<16x128xf32>
    %23 = arith.addf %17, %22 : vector<16x128xf32>
    %c0_6 = arith.constant 0 : index
    %c0_7 = arith.constant 0 : index
    %24 = vector.load %arg3[%c0_6, %c0_7] : memref<1x128xf32, #tpu.memory_space<vmem>>, vector<1x128xf32>
    %cst = arith.constant 0.000000e+00 : f32
    %25 = vector.broadcast %cst : f32 to vector<1x128xf32>
    %26 = arith.cmpf ogt, %24, %25 : vector<1x128xf32>
    %27 = math.cos %23 : vector<16x128xf32>
    %28 = math.sin %23 : vector<16x128xf32>
    %29 = vector.shape_cast %26 : vector<1x128xi1> to vector<1x128xi1>
    %30 = vector.broadcast %29 : vector<1x128xi1> to vector<16x128xi1>
    %31 = arith.select %30, %27, %28 : vector<16x128xi1>, vector<16x128xf32>
    %c0_8 = arith.constant 0 : index
    %c0_9 = arith.constant 0 : index
    %32 = vector.load %arg4[%c0_8, %c0_9] : memref<16x128xf32, #tpu.memory_space<vmem>>, vector<16x128xf32>
    tpu.vector_store %arg4[%c0_8, %c0_9], %31 {strides = array<i32>} : memref<16x128xf32, #tpu.memory_space<vmem>>, vector<16x128xf32>,
    return
  }
  func.func @transform_0(%arg0: i32) -> (i32, i32) {
    %c0_i32 = arith.constant 0 : i32
    %c0_i32_0 = arith.constant 0 : i32
    return %arg0, %c0_i32 : i32, i32
  }
  func.func @transform_1(%arg0: i32) -> (i32, i32) {
    %c0_i32 = arith.constant 0 : i32
    %c0_i32_0 = arith.constant 0 : i32
    %c0_i32_1 = arith.constant 0 : i32
    return %c0_i32, %c0_i32_0 : i32, i32
  }
  func.func @transform_2(%arg0: i32) -> (i32, i32) {
    %c0_i32 = arith.constant 0 : i32
    %c0_i32_0 = arith.constant 0 : i32
    %c0_i32_1 = arith.constant 0 : i32
    return %c0_i32, %c0_i32_0 : i32, i32
  }
  func.func @transform_3(%arg0: i32) -> (i32, i32) {
    %c0_i32 = arith.constant 0 : i32
    %c0_i32_0 = arith.constant 0 : i32
    return %arg0, %c0_i32 : i32, i32
  }
}

</mosaic_0001>

<bundles_post_ra>
// kernel: tpu_custom_call.1
= control target key start
LH: loop header
LB: loop body
LE: loop exit
PB: predicated region body
PF: predicated region fallthrough
CT: control target
= control target key end

     0   :  { %v604_v1 = vmov 1   ;;  %v605_v2 = vmov 0   ;;  %s732_s0 = inlined_call_operand.vmem [shape: f32[16,4], index: 0, kind: input, shape index: {}]   ;;  %s733_s1 = inlined_call_operand.vmem [shape: f32[4,128], index: 1, kind: input, shape index: {}]   ;;  %s734_s2 = inlined_call_operand.vmem [shape: f32[1,128], index: 2, kind: input, shape index: {}]   ;;  %s735_s3 = inlined_call_operand.hbm [shape: f32[16,128], index: 3, kind: output, shape index: {}]  }
   0x1   :  { %v15_v0 = vld [vmem:[%s732_s0] sm:$0xff]  ;;  %569 = vset.pattern.permute.xlu1 %v604_v1  ;;  %568 = vset.pattern.permute.xlu0 %v605_v2 }
   0x2   :  { %36 = vperm.xlu1 %569, %v15_v0   ;;  %20 = vperm.xlu0 %568, %v15_v0  }
   0x3   :  { %8 = vsyncpa [#allocation3], 0  ;;  %v16_v3 = vld [vmem:[%s732_s0 + $0x8] sm:$0xff]  ;;  %v606_v4 = vmov 2   ;;  %v607_v5 = vmov 3  }
   0x4   :  { %v528_v10 = vld [vmem:[%s733_s1 + $0x1] ss:$0 sm:$0xff]  ;;  %v527_v11 = vld [vmem:[%s733_s1] ss:$0 sm:$0xff]  ;;  %v529_v12 = vld [vmem:[%s733_s1 + $0x2] ss:$0 sm:$0xff] }
   0x5   :  { %v530_v21 = vld [vmem:[%s733_s1 + $0x3] ss:$0 sm:$0xff]  ;;  %v608_v52 = vmov 683565275   ;;  %v609_v56 = vmov 2475754826  }
   0x6   :  { %40 = vperm.xlu1 %569, %v16_v3   ;;  %25 = vperm.xlu0 %568, %v16_v3   ;;  %v610_v58 = vmov 2131351028   ;;  %v611_v60 = vmov 2102212464   ;;  %v612_v62 = vmov 920167782  }
   0xa   :  { %571 = vset.pattern.permute.xlu1 %v606_v4  ;;  %570 = vset.pattern.permute.xlu0 %v606_v4 }
   0xb   :  { %57 = vperm.xlu1 %571, %v16_v3   ;;  %53 = vperm.xlu0 %570, %v15_v0  }
   0xf   :  { %572 = vset.pattern.permute.xlu1 %v607_v5  ;;  %573 = vset.pattern.permute.xlu0 %v607_v5 }
  0x10   :  { %70 = vperm.xlu1 %572, %v15_v0   ;;  %74 = vperm.xlu0 %573, %v16_v3  }
  0x7d   :  { %v37_v6 = vpop.permute.xlu1 %36  ;;  %v21_v7 = vpop.permute.xlu0 %20 }
  0x7e   :  { %v47_v13 = vmul.f32 %v528_v10, %v37_v6  ;;  %v32_v14 = vmul.f32 %v527_v11, %v21_v7  ;;  %v613_v6 = vmov 1326507024  }
  0x80   :  { %v49_v22 = vadd.f32 %v47_v13, %v32_v14 }
  0x81   :  { %v41_v8 = vpop.permute.xlu1 %40  ;;  %v26_v9 = vpop.permute.xlu0 %25 }
  0x82   :  { %v48_v15 = vmul.f32 %v528_v10, %v41_v8  ;;  %v33_v16 = vmul.f32 %v527_v11, %v26_v9 }
  0x84   :  { %v50_v23 = vadd.f32 %v48_v15, %v33_v16 }
  0x86   :  { %v58_v17 = vpop.permute.xlu1 %57  ;;  %v54_v18 = vpop.permute.xlu0 %53 }
  0x87   :  { %v65_v19 = vmul.f32 %v529_v12, %v58_v17  ;;  %v64_v20 = vmul.f32 %v529_v12, %v54_v18 }
  0x89   :  { %v67_v26 = vadd.f32 %v65_v19, %v50_v23  ;;  %v66_v27 = vadd.f32 %v64_v20, %v49_v22 }
  0x8b   :  { %v71_v24 = vpop.permute.xlu1 %70  ;;  %v75_v25 = vpop.permute.xlu0 %74 }
  0x8c   :  { %v81_v28 = vmul.f32 %v530_v21, %v71_v24  ;;  %v82_v29 = vmul.f32 %v530_v21, %v75_v25 }
  0x8e   :  { %v656_v30 = vadd.f32 %v81_v28, %v66_v27  ;;  %v658_v31 = vadd.f32 %v82_v29, %v67_v26 }
  0x90   :  { %v87_v32 = vand.u32 2147483647, %v656_v30  ;;  %v90_v33 = vand.u32 2139095040, %v656_v30  ;;  %v193_v34 = vand.u32 2139095040, %v658_v31  ;;  %v190_v37 = vand.u32 2147483647, %v658_v31 }
  0x91   :  { %vm89_vm14 = vcmp.lt.s32.totalorder %v656_v30, 0 }
  0x92   :  { %v91_v35 = vshrl.u32 %v90_v33, 23  ;;  %v94_v36 = vand.u32 8388607, %v87_v32  ;;  %v194_v38 = vshrl.u32 %v193_v34, 23  ;;  %v668_v43 = vand.u32 8388607, %v190_v37 }
  0x93   :  { %vm88_vm15 = vcmp.le.f32.partialorder %v87_v32, 0.7853982 }
  0x94   :  { %v531_v39 = vadd.s32 4294967169, %v91_v35  ;;  %v535_v40 = vadd.s32 4294967169, %v194_v38  ;;  %v95_v42 = vor.u32 8388608, %v94_v36  ;;  %v198_v50 = vor.u32 8388608, %v668_v43 }
  0x96   :  { %v97_v41 = vadd.s32 1, %v531_v39  ;;  %v200_v44 = vadd.s32 1, %v535_v40  ;;  %v670_v49 = vshll.u32 %v95_v42, 8 }
  0x98   :  { %vm98_vm0 = vcmp.gt.s32.totalorder %v97_v41, 0  ;;  %vm201_vm1 = vcmp.gt.s32.totalorder %v200_v44, 0 }
  0x99   :  { %v99_v45 = vsel %vm98_vm0, %v97_v41, 0  ;;  %v202_v48 = vsel %vm201_vm1, %v200_v44, 0  ;;  %vm192_vm1 = vcmp.lt.s32.totalorder %v658_v31, 0 }
  0x9a   :  { %v100_v46 = vshrl.u32 %v99_v45, 5  ;;  %v101_v47 = vand.u32 31, %v99_v45  ;;  %v673_v54 = vshrl.u32 %v202_v48, 5  ;;  %v204_v55 = vand.u32 31, %v202_v48 }
  0x9b   :  { %v238_v45 = vshll.u32 %v198_v50, 8 }
  0x9c   :  { %v102_v51 = vsub.s32 32, %v101_v47  ;;  %v104_v53 = vshll.u32 %v608_v52, %v101_v47  ;;  %v107_v57 = vshll.u32 %v609_v56, %v101_v47  ;;  %v110_v59 = vshll.u32 %v610_v58, %v101_v47 }
  0x9d   :  { %v113_v61 = vshll.u32 %v611_v60, %v101_v47  ;;  %v116_v63 = vshll.u32 %v612_v62, %v101_v47  ;;  %vm119_vm2 = vcmp.lt.s32.totalorder %v100_v46, 1  ;;  %vm120_vm3 = vcmp.lt.s32.totalorder %v100_v46, 2 }
  0x9e   :  { %v105_v0 = vshrl.u32 %v609_v56, %v102_v51  ;;  %v108_v1 = vshrl.u32 %v610_v58, %v102_v51  ;;  %v111_v3 = vshrl.u32 %v611_v60, %v102_v51  ;;  %v103_v4 = vshrl.u32 %v608_v52, %v102_v51 }
  0x9f   :  { %v114_v5 = vshrl.u32 %v612_v62, %v102_v51  ;;  %v117_v7 = vshrl.u32 %v613_v6, %v102_v51  ;;  %v205_v11 = vsub.s32 32, %v204_v55  ;;  %vm121_vm4 = vcmp.lt.s32.totalorder %v100_v46, 3 }
  0xa0   :  { %v106_v8 = vor.u32 %v105_v0, %v104_v53  ;;  %v109_v9 = vor.u32 %v108_v1, %v107_v57  ;;  %v112_v10 = vor.u32 %v111_v3, %v110_v59  ;;  %vm122_vm5 = vcmp.lt.s32.totalorder %v100_v46, 4 }
  0xa1   :  { %v115_v12 = vor.u32 %v114_v5, %v113_v61  ;;  %v118_v13 = vor.u32 %v117_v7, %v116_v63  ;;  %v207_v21 = vshll.u32 %v608_v52, %v204_v55  ;;  %v208_v24 = vshrl.u32 %v609_v56, %v205_v11 }
  0xa2   :  { %v123_v14 = vsel %vm119_vm2, %v103_v4, %v106_v8  ;;  %v124_v15 = vsel %vm122_vm5, %v112_v10, 2102212464  ;;  %v127_v16 = vsel %vm119_vm2, %v106_v8, %v109_v9  ;;  %v131_v17 = vsel %vm119_vm2, %v109_v9, %v112_v10 }
  0xa3   :  { %v125_v18 = vsel %vm121_vm4, %v109_v9, %v124_v15  ;;  %v128_v19 = vsel %vm122_vm5, %v115_v12, 920167782  ;;  %v132_v20 = vsel %vm122_vm5, %v118_v13, 1326507024  ;;  %v210_v25 = vshll.u32 %v609_v56, %v204_v55 }
  0xa4   :  { %v129_v22 = vsel %vm121_vm4, %v112_v10, %v128_v19  ;;  %v133_v23 = vsel %vm121_vm4, %v115_v12, %v132_v20  ;;  %v126_v26 = vsel %vm120_vm3, %v123_v14, %v125_v18  ;;  %v211_v29 = vshrl.u32 %v610_v58, %v205_v11 }
  0xa5   :  { %v130_v27 = vsel %vm120_vm3, %v127_v16, %v129_v22  ;;  %v134_v28 = vsel %vm120_vm3, %v131_v17, %v133_v23  ;;  %v209_v38 = vor.u32 %v208_v24, %v207_v21  ;;  %v213_v40 = vshll.u32 %v610_v58, %v204_v55 }
  0xa6   :  { %v682_v33 = vmul.u32.u64.low %v670_v49, %v134_v28  ;;  %v683_v34 = vmul.u32.u64.high %v670_v49, %v134_v28, %v682_v33  ;;  %v686_v35 = vmul.u32.u64.low %v670_v49, %v130_v27  ;;  %v687_v36 = vmul.u32.u64.high %v670_v49, %v130_v27, %v686_v35 }
  0xa7   :  { %v212_v39 = vor.u32 %v211_v29, %v210_v25  ;;  %v214_v41 = vshrl.u32 %v611_v60, %v205_v11  ;;  %v216_v42 = vshll.u32 %v611_v60, %v204_v55  ;;  %v217_v43 = vshrl.u32 %v612_v62, %v205_v11 }
  0xa8   :  { %v220_v44 = vshrl.u32 %v613_v6, %v205_v11  ;;  %v142_v46 = vmul.u32 %v670_v49, %v126_v26  ;;  %v206_v47 = vshrl.u32 %v608_v52, %v205_v11  ;;  %v219_v51 = vshll.u32 %v612_v62, %v204_v55 }
  0xa9   :  { %v215_v48 = vor.u32 %v214_v41, %v213_v40  ;;  %vm144_vm6 = vc.u32 %v683_v34, %v686_v35  ;;  %v145_v53 = vadd.s32 1, %v687_v36  ;;  %v218_v56 = vor.u32 %v217_v43, %v216_v42 }
  0xaa   :  { %vm222_vm7 = vcmp.lt.s32.totalorder %v673_v54, 1  ;;  %v221_v57 = vor.u32 %v220_v44, %v219_v51  ;;  %vm224_vm8 = vcmp.lt.s32.totalorder %v673_v54, 3  ;;  %vm225_vm9 = vcmp.lt.s32.totalorder %v673_v54, 4 }
  0xab   :  { %v230_v58 = vsel %vm222_vm7, %v209_v38, %v212_v39  ;;  %v146_v50 = vsel %vm144_vm6, %v145_v53, %v687_v36  ;;  %v227_v59 = vsel %vm225_vm9, %v215_v48, 2102212464  ;;  %v231_v49 = vsel %vm225_vm9, %v218_v56, 920167782 }
  0xac   :  { %v234_v52 = vsel %vm222_vm7, %v212_v39, %v215_v48  ;;  %v147_v60 = vadd.s32 %v146_v50, %v142_v46  ;;  %vm223_vm10 = vcmp.lt.s32.totalorder %v673_v54, 2  ;;  %v232_v55 = vsel %vm224_vm8, %v215_v48, %v231_v49 }
  0xad   :  { %v235_v61 = vsel %vm225_vm9, %v221_v57, 1326507024  ;;  %v226_v62 = vsel %vm222_vm7, %v206_v47, %v209_v38  ;;  %v228_v63 = vsel %vm224_vm8, %v212_v39, %v227_v59  ;;  %v233_v0 = vsel %vm223_vm10, %v230_v58, %v232_v55 }
  0xae   :  { %v236_v1 = vsel %vm224_vm8, %v218_v56, %v235_v61  ;;  %v148_v3 = vadd.s32 536870912, %v147_v60  ;;  %v697_v5 = vmul.u32.u64.low %v238_v45, %v233_v0  ;;  %v698_v6 = vmul.u32.u64.high %v238_v45, %v233_v0, %v697_v5  ;;  %v85_v61 = vld [vmem:[%s734_s2] sm:$0x1]  ;;  %s614_s2 = smov [#allocation2]  }
  0xaf   :  { %v237_v4 = vsel %vm223_vm10, %v234_v52, %v236_v1  ;;  %v229_v10 = vsel %vm223_vm10, %v226_v62, %v228_v63  ;;  %v143_v26 = vadd.s32 %v686_v35, %v683_v34  ;;  %v502_v49 = vlaneseq  ;;  %s516_s24 = sshll.u32 %s614_s2, 4  ;;  %s517_s24 = int_to_ptr.vmem [resolvable:$true] %s516_s24 }
  0xb0   :  { %v700_v7 = vmul.u32.u64.low %v238_v45, %v237_v4  ;;  %v701_v8 = vmul.u32.u64.high %v238_v45, %v237_v4, %v700_v7  ;;  %v149_v9 = vshrl.u32 %v148_v3, 30  ;;  %v248_v12 = vadd.s32 1, %v698_v6  ;;  %s582_s25 = scalar_lea.vmem %s517_s24, 256  ;;  %p587_p1 = scmp.lt.s32.totalorder %s517_s24, %s517_s24 }
  0xb1   :  { %v245_v54 = vmul.u32 %v238_v45, %v229_v10  ;;  %v503_v1 = vshrl.u32 %v502_v49, 7  ;;  %vm86_vm0 = vcmp.gt.f32.partialorder %v85_v61, 0.0  ;;  %vm191_vm2 = vcmp.le.f32.partialorder %v190_v37, 0.7853982  ;;  %p583_p0 = scmp.ne.s32.totalorder %s517_s24, %s582_s25  ;;  %p588_p2 = scmp.lt.s32.totalorder %s582_s25, %s582_s25 }
  0xb2   :  { %v150_v11 = vshll.u32 %v149_v9, 30  ;;  %vm247_vm11 = vc.u32 %v701_v8, %v697_v5  ;;  %v246_v47 = vadd.s32 %v697_v5, %v701_v8  ;;  %v173_v58 = vsub.s32 4, %v149_v9 }
  0xb3   :  { %v249_v14 = vsel %vm247_vm11, %v248_v12, %v698_v6  ;;  %v504_v6 = vsub.s32 0, %v503_v1  ;;  %v501_v7 = vsel %vm86_vm0, 1, %v605_v2  ;;  %vm179_vm10 = vweird.f32 %v656_v30  ;;  %p589_p3 = por %p588_p2, %p587_p1 }
  0xb4   :  { %v151_v13 = vsub.s32 %v147_v60, %v150_v11  ;;  %v250_v15 = vadd.s32 %v249_v14, %v245_v54  ;;  %v174_v62 = vsel %vm89_vm14, %v173_v58, %v149_v9 }
  0xb5   :  { %v176_v4 = vsel %vm88_vm15, 0, %v174_v62  ;;  %v505_v11 = vrot.slane %v501_v7, %v504_v6  ;;  %p590_p4 = pnand %p589_p3, %p583_p0 }
  0xb6   :  { %v153_v16 = vsub.s32 0, %v151_v13  ;;  %v251_v17 = vadd.s32 536870912, %v250_v15  ;;  %v386_v8 = vadd.s32 3, %v176_v4  ;;  %v180_v54 = vand.u32 3, %v176_v4 }
  0xb7   :  { %vm506_vm3 = vcmp.eq.s32.totalorder %v505_v11, 1 }
  0xb8   :  { %v532_v18 = vmin.u32 %v153_v16, %v151_v13  ;;  %v706_v19 = vshrl.u32 %v251_v17, 30  ;;  %vm182_vm4 = vcmp.eq.s32.totalorder %v180_v54, 0  ;;  %vm185_vm5 = vcmp.eq.s32.totalorder %v180_v54, 2 }
  0xb9   :  { %vm181_vm8 = vcmp.lt.s32.totalorder %v180_v54, 2 }
  0xba   :  { %v155_v20 = vclz %v532_v18  ;;  %v253_v21 = vshll.u32 %v706_v19, 30  ;;  %v276_v32 = vsub.s32 4, %v706_v19 }
  0xbc   :  { %v533_v22 = vadd.s32 4294967294, %v155_v20  ;;  %v254_v23 = vsub.s32 %v250_v15, %v253_v21  ;;  %v277_v12 = vsel %vm192_vm1, %v276_v32, %v706_v19 }
  0xbd   :  { %v279_v15 = vsel %vm191_vm2, 0, %v277_v12 }
  0xbe   :  { %vm534_vm12 = vcmp.lt.s32.totalorder %v533_v22, 0  ;;  %v256_v25 = vsub.s32 0, %v254_v23  ;;  %v490_v37 = vadd.s32 3, %v279_v15 }
  0xbf   :  { %v158_v24 = vsel %vm534_vm12, 0, %v533_v22 }
  0xc0   :  { %v159_v27 = vsub.s32 32, %v158_v24  ;;  %v163_v28 = vsub.s32 4294967266, %v158_v24  ;;  %v536_v29 = vmin.u32 %v256_v25, %v254_v23  ;;  %v160_v33 = vshll.u32 %v151_v13, %v158_v24 }
  0xc1   :  { %v387_v13 = vand.u32 3, %v386_v8 }
  0xc2   :  { %v161_v36 = vshrl.u32 %v143_v26, %v159_v27  ;;  %v164_v38 = vadd.s32 127, %v163_v28  ;;  %v258_v39 = vclz %v536_v29  ;;  %v283_v26 = vand.u32 3, %v279_v15 }
  0xc3   :  { %vm392_vm6 = vcmp.eq.s32.totalorder %v387_v13, 2  ;;  %vm389_vm7 = vcmp.eq.s32.totalorder %v387_v13, 0  ;;  %vm388_vm9 = vcmp.lt.s32.totalorder %v387_v13, 2  ;;  %v491_v27 = vand.u32 3, %v490_v37 }
  0xc4   :  { %v162_v40 = vor.u32 %v161_v36, %v160_v33  ;;  %v165_v41 = vshll.u32 %v164_v38, 23  ;;  %v537_v42 = vadd.s32 4294967294, %v258_v39  ;;  %vm288_vm11 = vcmp.eq.s32.totalorder %v283_v26, 2 }
  0xc5   :  { %vm496_vm12 = vcmp.eq.s32.totalorder %v491_v27, 2  ;;  %vm492_vm0 = vcmp.lt.s32.totalorder %v491_v27, 2 }
  0xc6   :  { %v166_v43 = vor.u32 4788187, %v165_v41  ;;  %vm538_vm13 = vcmp.lt.s32.totalorder %v537_v42, 0  ;;  %v169_v45 = vcvt.s32.f32 %v162_v40 }
  0xc7   :  { %v261_v46 = vsel %vm538_vm13, 0, %v537_v42  ;;  %vm285_vm13 = vcmp.eq.s32.totalorder %v283_v26, 0 }
  0xc8   :  { %v167_v44 = vand.u32 2147483647, %v166_v43  ;;  %v262_v48 = vsub.s32 32, %v261_v46  ;;  %v266_v51 = vsub.s32 4294967266, %v261_v46  ;;  %v263_v35 = vshll.u32 %v254_v23, %v261_v46 }
  0xca   :  { %v170_v34 = vmul.f32 %v169_v45, %v167_v44  ;;  %v264_v53 = vshrl.u32 %v246_v47, %v262_v48  ;;  %v267_v56 = vadd.s32 127, %v266_v51 }
  0xcc   :  { %v171_v57 = vxor.u32 2147483648, %v170_v34  ;;  %v265_v50 = vor.u32 %v264_v53, %v263_v35  ;;  %v268_v59 = vshll.u32 %v267_v56, 23 }
  0xce   :  { %v172_v52 = vsel %vm89_vm14, %v171_v57, %v170_v34  ;;  %v269_v55 = vor.u32 4788187, %v268_v59  ;;  %v272_v0 = vcvt.s32.f32 %v265_v50  ;;  %vm493_vm14 = vcmp.eq.s32.totalorder %v491_v27, 0 }
  0xcf   :  { %v175_v60 = vsel %vm88_vm15, %v656_v30, %v172_v52  ;;  %vm284_vm15 = vcmp.lt.s32.totalorder %v283_v26, 2 }
  0xd0   :  { %574 = vcosq.f32 %v175_v60  ;;  %v270_v63 = vand.u32 2147483647, %v269_v55 }
  0xd1   :  { %576 = vsinq.f32 %v175_v60 }
  0xd2   :  { %v273_v3 = vmul.f32 %v272_v0, %v270_v63 }
  0xd4   :  { %v274_v5 = vxor.u32 2147483648, %v273_v3 }
  0xd6   :  { %v275_v9 = vsel %vm192_vm1, %v274_v5, %v273_v3  ;;  %vm282_vm1 = vweird.f32 %v658_v31 }
  0xd7   :  { %v278_v10 = vsel %vm191_vm2, %v658_v31, %v275_v9 }
  0xd8   :  { %578 = vcosq.f32 %v278_v10 }
  0xd9   :  { %580 = vsinq.f32 %v278_v10 }
  0xdd   :  { %v575_v14 = vpop.eup %574 }
  0xde   :  { %v577_v16 = vpop.eup %576  ;;  %v186_v17 = vxor.u32 2147483648, %v575_v14 }
  0xdf   :  { %v183_v2 = vxor.u32 2147483648, %v577_v16 }
  0xe0   :  { %v187_v18 = vsel %vm185_vm5, %v186_v17, %v577_v16  ;;  %v394_v20 = vsel %vm392_vm6, %v186_v17, %v577_v16 }
  0xe1   :  { %v184_v21 = vsel %vm182_vm4, %v575_v14, %v183_v2  ;;  %v391_v19 = vsel %vm389_vm7, %v575_v14, %v183_v2 }
  0xe2   :  { %v188_v22 = vsel %vm181_vm8, %v184_v21, %v187_v18  ;;  %v395_v23 = vsel %vm388_vm9, %v391_v19, %v394_v20 }
  0xe3   :  { %v189_v24 = vsel %vm179_vm10, nan, %v188_v22  ;;  %v396_v25 = vsel %vm179_vm10, nan, %v395_v23 }
  0xe4   :  { %v507_v28 = vsel %vm506_vm3, %v189_v24, %v396_v25 }
  0xe5   :  { %509 = vst [vmem:[#allocation2] sm:$0xff] %v507_v28  ;;  %v579_v29 = vpop.eup %578 }
  0xe6   :  { %v581_v33 = vpop.eup %580  ;;  %v289_v36 = vxor.u32 2147483648, %v579_v29 }
  0xe7   :  { %v286_v38 = vxor.u32 2147483648, %v581_v33 }
  0xe8   :  { %v290_v39 = vsel %vm288_vm11, %v289_v36, %v581_v33  ;;  %v498_v40 = vsel %vm496_vm12, %v289_v36, %v581_v33 }
  0xe9   :  { %v287_v30 = vsel %vm285_vm13, %v579_v29, %v286_v38  ;;  %v495_v41 = vsel %vm493_vm14, %v579_v29, %v286_v38 }
  0xea   :  { %v291_v42 = vsel %vm284_vm15, %v287_v30, %v290_v39  ;;  %v499_v43 = vsel %vm492_vm0, %v495_v41, %v498_v40 }
  0xeb   :  { %v292_v44 = vsel %vm282_vm1, nan, %v291_v42  ;;  %v500_v45 = vsel %vm282_vm1, nan, %v499_v43 }
  0xec   :  { %v508_v46 = vsel %vm506_vm3, %v292_v44, %v500_v45 }
  0xed   :  { %510 = vst [vmem:[#allocation2 + $0x8] sm:$0xff] %v508_v46 }
  0xee   :  { %593 = shalt.err (!%p590_p4)
}
  0xef   :  { %s615_s26 = smov 128   ;;  %s616_s27 = smov 8  }
  0xf0   :  { %522 = dma.vmem_to_hbm [thread:$0]  %s517_s24, 256, %s735_s3, [#allocation3], %s615_s26, %s615_s26, %s616_s27  }
  0xf1   :  { %602 = dma.done.wait [#allocation3], 256  }
  0xf2   :  { %603 = vsyncadd [#allocation3], 4294967040 }
  0xf3   :  { %526 = vsyncpa [#allocation3], 1 }

</bundles_post_ra>
